<compile_context>
chip_gen: v7x
topology: tpu7x:2x2x1
jax: 0.10.0
libtpu: 0.0.40
codegen_flags: <defaults>
</compile_context>

<pallas_src>
import functools

import jax
import jax.numpy as jnp
import numpy as np
from jax import lax
from jax.experimental import pallas as pl
from jax.experimental.pallas import tpu as pltpu


def _local_grouper_kernel(xyz_ref, xyz_t_ref, pts_ref, new_xyz_ref, new_pts_ref,
                          *, S, K):
    Bt, N, _ = xyz_ref.shape
    D = pts_ref.shape[2]

    col_1n = lax.broadcasted_iota(jnp.int32, (1, N), 1)   # (1, N)
    col_sn = lax.broadcasted_iota(jnp.int32, (S, N), 1)   # (S, N)
    row_s1 = lax.broadcasted_iota(jnp.int32, (S, 1), 0)   # (S, 1)

    for b in range(Bt):                                   # static unroll over batch block
        xyz = xyz_ref[b].astype(jnp.float32)              # (N, 3)  (only for gathers)
        xyz_t = xyz_t_ref[b].astype(jnp.float32)          # (3, N)  lane-dense coords
        pts = pts_ref[b].astype(jnp.float32)              # (N, D)

        x0 = xyz_t[0:1, :]                                # (1, N)
        x1 = xyz_t[1:2, :]
        x2 = xyz_t[2:3, :]

        # ------------- furthest point sampling (serial, S steps) -------------
        # Carry only the scalar "farthest", the (1, N) running min-dist and an
        # (S, 1) vector of picked indices.  Centroid comes from a masked lane
        # reduce (VPU + XLU only -- no MXU round-trip on the serial chain).
        def fps_body(i, carry):
            min_dist, farthest, idxs = carry
            idxs = jnp.where(row_s1 == i, farthest, idxs)                 # record pick i
            sel_mask = col_1n == farthest                                 # (1, N)
            centroid = jnp.sum(jnp.where(sel_mask, xyz_t, 0.0),
                               axis=-1, keepdims=True)                    # (3, 1)
            d = ((x0 - centroid[0:1, :]) ** 2
                 + (x1 - centroid[1:2, :]) ** 2
                 + (x2 - centroid[2:3, :]) ** 2)                          # (1, N)
            min_dist = jnp.minimum(min_dist, d)
            mx = jnp.max(min_dist)
            farthest = jnp.min(jnp.where(min_dist >= mx, col_1n, N))      # first argmax
            return min_dist, farthest, idxs

        init = (jnp.full((1, N), 1e10, jnp.float32),
                jnp.int32(0),
                jnp.zeros((S, 1), jnp.int32))
        _, _, fps_idx = lax.fori_loop(0, S, fps_body, init)

        # One-hot selection built once; sampled coords/features via MXU matmuls.
        sel = (col_sn == fps_idx).astype(jnp.float32)                     # (S, N)
        new_xyz = jnp.dot(sel, xyz, preferred_element_type=jnp.float32)   # (S, 3)
        ctr = jnp.dot(sel, pts, preferred_element_type=jnp.float32)       # (S, D)
        new_xyz_ref[b] = new_xyz.astype(new_xyz_ref.dtype)

        # ------------- kNN squared distances: expansion form, lane-dense -----
        x_norm = x0 * x0 + x1 * x1 + x2 * x2                              # (1, N)
        c_norm = (new_xyz[:, 0:1] ** 2 + new_xyz[:, 1:2] ** 2
                  + new_xyz[:, 2:3] ** 2)                                 # (S, 1)
        prod = (new_xyz[:, 0:1] * x0 + new_xyz[:, 1:2] * x1
                + new_xyz[:, 2:3] * x2)                                   # (S, N)
        sqr = c_norm + x_norm - 2.0 * prod                                # (S, N)

        # ------------- K nearest via iterative first-index argmin ------------
        # Only the one-hots are built inside the loop; all K gathers collapse
        # into a single (K*S, N) @ (N, D) MXU matmul afterwards.
        onehots = []
        for _ in range(K):
            mn = jnp.min(sqr, axis=-1, keepdims=True)                     # (S, 1)
            idxk = jnp.min(jnp.where(sqr <= mn, col_sn, N),
                           axis=-1, keepdims=True)                        # (S, 1)
            oh = (col_sn == idxk).astype(jnp.float32)                     # (S, N)
            sqr = jnp.where(oh > 0, jnp.inf, sqr)                         # mask pick
            onehots.append(oh)

        big_oh = jnp.concatenate(onehots, axis=0)                         # (K*S, N)
        gathered = jnp.dot(big_oh, pts,
                           preferred_element_type=jnp.float32)            # (K*S, D)

        # ------------- lane-dense output slab: (S, K*2*D), stored once -------
        pieces = []
        for k in range(K):
            gk = gathered[k * S:(k + 1) * S, :]                           # (S, D)
            pieces.append(gk - ctr)
            pieces.append(ctr)
        slab = jnp.concatenate(pieces, axis=-1)                           # (S, K*2*D)
        new_pts_ref[b] = slab.astype(new_pts_ref.dtype)


def local_grouper(xyz, points, groups, kneighbors, *, batch_block=1):
    """Returns (new_xyz [B,S,3], new_points [B,S,K,2D])."""
    B, N, C = xyz.shape
    D = points.shape[-1]
    S, K = groups, kneighbors
    if B % batch_block != 0:
        batch_block = 1
    Bt = batch_block

    xyz_t = jnp.swapaxes(xyz, 1, 2)                        # (B, 3, N): N on lane axis

    kernel = functools.partial(_local_grouper_kernel, S=S, K=K)
    new_xyz, new_pts_flat = pl.pallas_call(
        kernel,
        out_shape=(jax.ShapeDtypeStruct((B, S, C), xyz.dtype),
                   jax.ShapeDtypeStruct((B, S, K * 2 * D), points.dtype)),
        grid_spec=pltpu.PrefetchScalarGridSpec(
            num_scalar_prefetch=0,
            grid=(B // Bt,),
            in_specs=[pl.BlockSpec((Bt, N, C), lambda b: (b, 0, 0)),
                      pl.BlockSpec((Bt, C, N), lambda b: (b, 0, 0)),
                      pl.BlockSpec((Bt, N, D), lambda b: (b, 0, 0))],
            out_specs=[pl.BlockSpec((Bt, S, C), lambda b: (b, 0, 0)),
                       pl.BlockSpec((Bt, S, K * 2 * D), lambda b: (b, 0, 0))]),
        compiler_params=pltpu.CompilerParams(
            dimension_semantics=("parallel",),             # independent batch blocks
            vmem_limit_bytes=64 * 1024 * 1024),
    )(xyz, xyz_t, points)

    new_pts = new_pts_flat.reshape(B, S, K, 2 * D)
    return new_xyz, new_pts


def _reference(xyz, points, S, K):
    """Pure-JAX reference with identical FPS / kNN / distance semantics."""
    B, N, _ = xyz.shape

    def fps(x):
        def body(i, carry):
            min_dist, farthest, idxs = carry
            idxs = idxs.at[i].set(farthest)
            c = x[farthest]
            d = ((x[:, 0] - c[0]) ** 2 + (x[:, 1] - c[1]) ** 2
                 + (x[:, 2] - c[2]) ** 2)
            min_dist = jnp.minimum(min_dist, d)
            farthest = jnp.argmax(min_dist).astype(jnp.int32)
            return min_dist, farthest, idxs

        init = (jnp.full((N,), 1e10, jnp.float32), jnp.int32(0),
                jnp.zeros((S,), jnp.int32))
        return lax.fori_loop(0, S, body, init)[2]

    fps_idx = jax.vmap(fps)(xyz)                                           # [B, S]
    new_xyz = jax.vmap(lambda x, i: x[i])(xyz, fps_idx)                    # [B, S, 3]
    ctr = jax.vmap(lambda p, i: p[i])(points, fps_idx)                     # [B, S, D]

    xt = jnp.swapaxes(xyz, 1, 2)                                           # [B, 3, N]
    x_norm = xt[:, 0:1, :] ** 2 + xt[:, 1:2, :] ** 2 + xt[:, 2:3, :] ** 2  # [B,1,N]
    c_norm = (new_xyz[:, :, 0:1] ** 2 + new_xyz[:, :, 1:2] ** 2
              + new_xyz[:, :, 2:3] ** 2)                                   # [B,S,1]
    prod = (new_xyz[:, :, 0:1] * xt[:, 0:1, :]
            + new_xyz[:, :, 1:2] * xt[:, 1:2, :]
            + new_xyz[:, :, 2:3] * xt[:, 2:3, :])                          # [B,S,N]
    sqr = c_norm + x_norm - 2.0 * prod                                     # [B,S,N]

    _, knn_idx = lax.top_k(-sqr, K)                                        # [B, S, K]
    grouped = jax.vmap(lambda p, i: p[i])(points, knn_idx)                 # [B, S, K, D]
    new_points = jnp.concatenate(
        [grouped - ctr[:, :, None, :],
         jnp.broadcast_to(ctr[:, :, None, :], grouped.shape)], axis=-1)
    return new_xyz, new_points


if __name__ == "__main__":
    key = jax.random.PRNGKey(0)
    k1, k2 = jax.random.split(key)
    B, N, D = 2, 64, 16
    groups, kneighbors = 8, 4

    xyz = jax.random.normal(k1, (B, N, 3), jnp.float32)
    points = jax.random.normal(k2, (B, N, D), jnp.float32)

    ref_xyz, ref_pts = _reference(xyz, points, groups, kneighbors)

    # batch_block=1 exercises the per-batch "parallel" path (v7x megacore);
    # batch_block=2 exercises the multi-batch-per-step path (v5e/v6e overhead
    # amortization).
    for bb in (1, 2):
        new_xyz, new_pts = local_grouper(xyz, points, groups, kneighbors,
                                         batch_block=bb)
        jax.block_until_ready((new_xyz, new_pts))

        assert new_xyz.shape == (B, groups, 3)
        assert new_pts.shape == (B, groups, kneighbors, 2 * D)

        np.testing.assert_allclose(np.asarray(new_xyz), np.asarray(ref_xyz),
                                    rtol=1e-5, atol=1e-5)
        np.testing.assert_allclose(np.asarray(new_pts), np.asarray(ref_pts),
                                    rtol=1e-5, atol=1e-5)

    print("KERNEL_OK")
</pallas_src>

<mosaic_0001>
module attributes {stable_mosaic.version = 11 : i64} {
  func.func @_local_grouper_kernel(%arg0: i32, %arg1: memref<1x64x3xf32, #tpu.memory_space<vmem>>, %arg2: memref<1x3x64xf32, #tpu.memory_space<vmem>>, %arg3: memref<1x64x16xf32, #tpu.memory_space<vmem>>, %arg4: memref<1x8x3xf32, #tpu.memory_space<vmem>>, %arg5: memref<1x8x128xf32, #tpu.memory_space<vmem>>) attributes {dimension_semantics = [#tpu.dimension_semantics<parallel>], iteration_bounds = array<i64: 2>, scalar_prefetch = 0 : i64, scratch_operands = 0 : i64, tpu.core_type = #tpu.core_type<tc>, window_params = [{transform_indices = @transform_0, window_bounds = array<i64: 1, 64, 3>}, {transform_indices = @transform_1, window_bounds = array<i64: 1, 3, 64>}, {transform_indices = @transform_2, window_bounds = array<i64: 1, 64, 16>}, {transform_indices = @transform_3, window_bounds = array<i64: 1, 8, 3>}, {transform_indices = @transform_4, window_bounds = array<i64: 1, 8, 128>}]} {
    %0 = tpu.iota {dimensions = array<i32: 1>} : vector<1x64xi32>
    %1 = tpu.iota {dimensions = array<i32: 1>} : vector<8x64xi32>
    %2 = tpu.iota {dimensions = array<i32: 0>} : vector<8x1xi32>
    %c0 = arith.constant 0 : index
    %c0_0 = arith.constant 0 : index
    %c0_1 = arith.constant 0 : index
    %3 = vector.load %arg1[%c0, %c0_0, %c0_1] : memref<1x64x3xf32, #tpu.memory_space<vmem>>, vector<1x64x3xf32>
    %4 = vector.shape_cast %3 : vector<1x64x3xf32> to vector<64x3xf32>
    %c0_2 = arith.constant 0 : index
    %c0_3 = arith.constant 0 : index
    %c0_4 = arith.constant 0 : index
    %5 = vector.load %arg2[%c0_2, %c0_3, %c0_4] : memref<1x3x64xf32, #tpu.memory_space<vmem>>, vector<1x3x64xf32>
    %6 = vector.shape_cast %5 : vector<1x3x64xf32> to vector<3x64xf32>
    %c0_5 = arith.constant 0 : index
    %c0_6 = arith.constant 0 : index
    %c0_7 = arith.constant 0 : index
    %7 = vector.load %arg3[%c0_5, %c0_6, %c0_7] : memref<1x64x16xf32, #tpu.memory_space<vmem>>, vector<1x64x16xf32>
    %8 = vector.shape_cast %7 : vector<1x64x16xf32> to vector<64x16xf32>
    %9 = vector.extract_strided_slice %6 {offsets = [0, 0], sizes = [1, 64], strides = [1, 1]} : vector<3x64xf32> to vector<1x64xf32>
    %10 = vector.extract_strided_slice %6 {offsets = [1, 0], sizes = [1, 64], strides = [1, 1]} : vector<3x64xf32> to vector<1x64xf32>
    %11 = vector.extract_strided_slice %6 {offsets = [2, 0], sizes = [1, 64], strides = [1, 1]} : vector<3x64xf32> to vector<1x64xf32>
    %cst = arith.constant 1.000000e+10 : f32
    %12 = vector.broadcast %cst : f32 to vector<1x64xf32>
    %c0_i32 = arith.constant 0 : i32
    %13 = vector.broadcast %c0_i32 : i32 to vector<8x1xi32>
    %c0_i32_8 = arith.constant 0 : i32
    %c0_i32_9 = arith.constant 0 : i32
    %c8_i32 = arith.constant 8 : i32
    %14 = arith.addi %c0_i32_9, %c8_i32 : i32
    %c1_i32 = arith.constant 1 : i32
    %15:3 = scf.for %arg6 = %c0_i32_9 to %14 step %c1_i32 iter_args(%arg7 = %12, %arg8 = %c0_i32_8, %arg9 = %13) -> (vector<1x64xf32>, i32, vector<8x1xi32>)  : i32 {
      %132 = vector.broadcast %arg6 : i32 to vector<8x1xi32>
      %133 = arith.cmpi eq, %2, %132 : vector<8x1xi32>
      %134 = vector.broadcast %arg8 : i32 to vector<8x1xi32>
      %135 = arith.select %133, %134, %arg9 : vector<8x1xi1>, vector<8x1xi32>
      %136 = vector.broadcast %arg8 : i32 to vector<1x64xi32>
      %137 = arith.cmpi eq, %0, %136 : vector<1x64xi32>
      %cst_38 = arith.constant 0.000000e+00 : f32
      %138 = vector.shape_cast %137 : vector<1x64xi1> to vector<1x64xi1>
      %139 = vector.broadcast %138 : vector<1x64xi1> to vector<3x64xi1>
      %140 = vector.broadcast %cst_38 : f32 to vector<3x64xf32>
      %141 = arith.select %139, %6, %140 : vector<3x64xi1>, vector<3x64xf32>
      %cst_39 = arith.constant dense<0.000000e+00> : vector<3xf32>
      %142 = vector.multi_reduction <add>, %141, %cst_39 [1] : vector<3x64xf32> to vector<3xf32>
      %143 = vector.shape_cast %142 : vector<3xf32> to vector<3x1xf32>
      %144 = vector.extract_strided_slice %143 {offsets = [0, 0], sizes = [1, 1], strides = [1, 1]} : vector<3x1xf32> to vector<1x1xf32>
      %145 = vector.broadcast %144 : vector<1x1xf32> to vector<1x64xf32>
      %146 = arith.subf %9, %145 : vector<1x64xf32>
      %147 = arith.mulf %146, %146 : vector<1x64xf32>
      %148 = vector.extract_strided_slice %143 {offsets = [1, 0], sizes = [1, 1], strides = [1, 1]} : vector<3x1xf32> to vector<1x1xf32>
      %149 = vector.broadcast %148 : vector<1x1xf32> to vector<1x64xf32>
      %150 = arith.subf %10, %149 : vector<1x64xf32>
      %151 = arith.mulf %150, %150 : vector<1x64xf32>
      %152 = arith.addf %147, %151 : vector<1x64xf32>
      %153 = vector.extract_strided_slice %143 {offsets = [2, 0], sizes = [1, 1], strides = [1, 1]} : vector<3x1xf32> to vector<1x1xf32>
      %154 = vector.broadcast %153 : vector<1x1xf32> to vector<1x64xf32>
      %155 = arith.subf %11, %154 : vector<1x64xf32>
      %156 = arith.mulf %155, %155 : vector<1x64xf32>
      %157 = arith.addf %152, %156 : vector<1x64xf32>
      %158 = arith.minimumf %arg7, %157 : vector<1x64xf32>
      %159 = vector.shape_cast %158 : vector<1x64xf32> to vector<1x1x64xf32>
      %cst_40 = arith.constant dense<0xFF800000> : vector<1xf32>
      %160 = vector.multi_reduction <maximumf>, %159, %cst_40 [1, 2] : vector<1x1x64xf32> to vector<1xf32>
      %161 = vector.shape_cast %160 : vector<1xf32> to vector<1x1x1xf32>
      %162 = vector.extract %161[0, 0, 0] : f32 from vector<1x1x1xf32>
      %163 = vector.broadcast %162 : f32 to vector<1x64xf32>
      %164 = arith.cmpf oge, %158, %163 : vector<1x64xf32>
      %c64_i32_41 = arith.constant 64 : i32
      %165 = vector.broadcast %c64_i32_41 : i32 to vector<1x64xi32>
      %166 = arith.select %164, %0, %165 : vector<1x64xi1>, vector<1x64xi32>
      %167 = vector.shape_cast %166 : vector<1x64xi32> to vector<1x1x64xi32>
      %cst_42 = arith.constant dense<2147483647> : vector<1xi32>
      %168 = vector.multi_reduction <minsi>, %167, %cst_42 [1, 2] : vector<1x1x64xi32> to vector<1xi32>
      %169 = vector.shape_cast %168 : vector<1xi32> to vector<1x1x1xi32>
      %170 = vector.extract %169[0, 0, 0] : i32 from vector<1x1x1xi32>
      scf.yield %158, %170, %135 : vector<1x64xf32>, i32, vector<8x1xi32>
    }
    %c8_i32_10 = arith.constant 8 : i32
    %16 = vector.broadcast %15#2 : vector<8x1xi32> to vector<8x64xi32>
    %17 = arith.cmpi eq, %1, %16 : vector<8x64xi32>
    %18 = arith.extui %17 : vector<8x64xi1> to vector<8x64xi32>
    %19 = arith.sitofp %18 : vector<8x64xi32> to vector<8x64xf32>
    %cst_11 = arith.constant dense<0.000000e+00> : vector<8x3xf32>
    %20 = tpu.matmul %19, %4, %cst_11 {dimension_numbers = #tpu.dot_dimension_numbers<[1], [0], [0], [1], [0, 0, 1, 1], [], []>} : vector<8x64xf32>, vector<64x3xf32>, vector<8x3xf32> -> vector<8x3xf32>
    %cst_12 = arith.constant dense<0.000000e+00> : vector<8x16xf32>
    %21 = tpu.matmul %19, %8, %cst_12 {dimension_numbers = #tpu.dot_dimension_numbers<[1], [0], [0], [1], [0, 0, 1, 1], [], []>} : vector<8x64xf32>, vector<64x16xf32>, vector<8x16xf32> -> vector<8x16xf32>
    %c0_13 = arith.constant 0 : index
    %c0_14 = arith.constant 0 : index
    %c0_15 = arith.constant 0 : index
    %22 = vector.load %arg4[%c0_13, %c0_14, %c0_15] : memref<1x8x3xf32, #tpu.memory_space<vmem>>, vector<1x8x3xf32>
    %23 = vector.shape_cast %22 : vector<1x8x3xf32> to vector<8x3xf32>
    %24 = vector.shape_cast %20 : vector<8x3xf32> to vector<1x8x3xf32>
    tpu.vector_store %arg4[%c0_13, %c0_14, %c0_15], %24 {strides = array<i32>} : memref<1x8x3xf32, #tpu.memory_space<vmem>>, vector<1x8x3xf32>,
    %25 = arith.mulf %9, %9 : vector<1x64xf32>
    %26 = arith.mulf %10, %10 : vector<1x64xf32>
    %27 = arith.addf %25, %26 : vector<1x64xf32>
    %28 = arith.mulf %11, %11 : vector<1x64xf32>
    %29 = arith.addf %27, %28 : vector<1x64xf32>
    %30 = vector.extract_strided_slice %20 {offsets = [0, 0], sizes = [8, 1], strides = [1, 1]} : vector<8x3xf32> to vector<8x1xf32>
    %31 = arith.mulf %30, %30 : vector<8x1xf32>
    %32 = vector.extract_strided_slice %20 {offsets = [0, 1], sizes = [8, 1], strides = [1, 1]} : vector<8x3xf32> to vector<8x1xf32>
    %33 = arith.mulf %32, %32 : vector<8x1xf32>
    %34 = arith.addf %31, %33 : vector<8x1xf32>
    %35 = vector.extract_strided_slice %20 {offsets = [0, 2], sizes = [8, 1], strides = [1, 1]} : vector<8x3xf32> to vector<8x1xf32>
    %36 = arith.mulf %35, %35 : vector<8x1xf32>
    %37 = arith.addf %34, %36 : vector<8x1xf32>
    %38 = vector.extract_strided_slice %20 {offsets = [0, 0], sizes = [8, 1], strides = [1, 1]} : vector<8x3xf32> to vector<8x1xf32>
    %39 = vector.broadcast %38 : vector<8x1xf32> to vector<8x64xf32>
    %40 = vector.broadcast %9 : vector<1x64xf32> to vector<8x64xf32>
    %41 = arith.mulf %39, %40 : vector<8x64xf32>
    %42 = vector.extract_strided_slice %20 {offsets = [0, 1], sizes = [8, 1], strides = [1, 1]} : vector<8x3xf32> to vector<8x1xf32>
    %43 = vector.broadcast %42 : vector<8x1xf32> to vector<8x64xf32>
    %44 = vector.broadcast %10 : vector<1x64xf32> to vector<8x64xf32>
    %45 = arith.mulf %43, %44 : vector<8x64xf32>
    %46 = arith.addf %41, %45 : vector<8x64xf32>
    %47 = vector.extract_strided_slice %20 {offsets = [0, 2], sizes = [8, 1], strides = [1, 1]} : vector<8x3xf32> to vector<8x1xf32>
    %48 = vector.broadcast %47 : vector<8x1xf32> to vector<8x64xf32>
    %49 = vector.broadcast %11 : vector<1x64xf32> to vector<8x64xf32>
    %50 = arith.mulf %48, %49 : vector<8x64xf32>
    %51 = arith.addf %46, %50 : vector<8x64xf32>
    %52 = vector.broadcast %37 : vector<8x1xf32> to vector<8x64xf32>
    %53 = vector.broadcast %29 : vector<1x64xf32> to vector<8x64xf32>
    %54 = arith.addf %52, %53 : vector<8x64xf32>
    %cst_16 = arith.constant 2.000000e+00 : f32
    %55 = vector.broadcast %cst_16 : f32 to vector<8x64xf32>
    %56 = arith.mulf %55, %51 : vector<8x64xf32>
    %57 = arith.subf %54, %56 : vector<8x64xf32>
    %cst_17 = arith.constant dense<0x7F800000> : vector<8xf32>
    %58 = vector.multi_reduction <minimumf>, %57, %cst_17 [1] : vector<8x64xf32> to vector<8xf32>
    %59 = vector.shape_cast %58 : vector<8xf32> to vector<8x1xf32>
    %60 = vector.broadcast %59 : vector<8x1xf32> to vector<8x64xf32>
    %61 = arith.cmpf ole, %57, %60 : vector<8x64xf32>
    %c64_i32 = arith.constant 64 : i32
    %62 = vector.broadcast %c64_i32 : i32 to vector<8x64xi32>
    %63 = arith.select %61, %1, %62 : vector<8x64xi1>, vector<8x64xi32>
    %cst_18 = arith.constant dense<2147483647> : vector<8xi32>
    %64 = vector.multi_reduction <minsi>, %63, %cst_18 [1] : vector<8x64xi32> to vector<8xi32>
    %65 = vector.shape_cast %64 : vector<8xi32> to vector<8x1xi32>
    %66 = vector.broadcast %65 : vector<8x1xi32> to vector<8x64xi32>
    %67 = arith.cmpi eq, %1, %66 : vector<8x64xi32>
    %68 = arith.extui %67 : vector<8x64xi1> to vector<8x64xi32>
    %69 = arith.sitofp %68 : vector<8x64xi32> to vector<8x64xf32>
    %cst_19 = arith.constant 0.000000e+00 : f32
    %70 = vector.broadcast %cst_19 : f32 to vector<8x64xf32>
    %71 = arith.cmpf ogt, %69, %70 : vector<8x64xf32>
    %cst_20 = arith.constant 0x7F800000 : f32
    %72 = vector.broadcast %cst_20 : f32 to vector<8x64xf32>
    %73 = arith.select %71, %72, %57 : vector<8x64xi1>, vector<8x64xf32>
    %cst_21 = arith.constant dense<0x7F800000> : vector<8xf32>
    %74 = vector.multi_reduction <minimumf>, %73, %cst_21 [1] : vector<8x64xf32> to vector<8xf32>
    %75 = vector.shape_cast %74 : vector<8xf32> to vector<8x1xf32>
    %76 = vector.broadcast %75 : vector<8x1xf32> to vector<8x64xf32>
    %77 = arith.cmpf ole, %73, %76 : vector<8x64xf32>
    %c64_i32_22 = arith.constant 64 : i32
    %78 = vector.broadcast %c64_i32_22 : i32 to vector<8x64xi32>
    %79 = arith.select %77, %1, %78 : vector<8x64xi1>, vector<8x64xi32>
    %cst_23 = arith.constant dense<2147483647> : vector<8xi32>
    %80 = vector.multi_reduction <minsi>, %79, %cst_23 [1] : vector<8x64xi32> to vector<8xi32>
    %81 = vector.shape_cast %80 : vector<8xi32> to vector<8x1xi32>
    %82 = vector.broadcast %81 : vector<8x1xi32> to vector<8x64xi32>
    %83 = arith.cmpi eq, %1, %82 : vector<8x64xi32>
    %84 = arith.extui %83 : vector<8x64xi1> to vector<8x64xi32>
    %85 = arith.sitofp %84 : vector<8x64xi32> to vector<8x64xf32>
    %cst_24 = arith.constant 0.000000e+00 : f32
    %86 = vector.broadcast %cst_24 : f32 to vector<8x64xf32>
    %87 = arith.cmpf ogt, %85, %86 : vector<8x64xf32>
    %cst_25 = arith.constant 0x7F800000 : f32
    %88 = vector.broadcast %cst_25 : f32 to vector<8x64xf32>
    %89 = arith.select %87, %88, %73 : vector<8x64xi1>, vector<8x64xf32>
    %cst_26 = arith.constant dense<0x7F800000> : vector<8xf32>
    %90 = vector.multi_reduction <minimumf>, %89, %cst_26 [1] : vector<8x64xf32> to vector<8xf32>
    %91 = vector.shape_cast %90 : vector<8xf32> to vector<8x1xf32>
    %92 = vector.broadcast %91 : vector<8x1xf32> to vector<8x64xf32>
    %93 = arith.cmpf ole, %89, %92 : vector<8x64xf32>
    %c64_i32_27 = arith.constant 64 : i32
    %94 = vector.broadcast %c64_i32_27 : i32 to vector<8x64xi32>
    %95 = arith.select %93, %1, %94 : vector<8x64xi1>, vector<8x64xi32>
    %cst_28 = arith.constant dense<2147483647> : vector<8xi32>
    %96 = vector.multi_reduction <minsi>, %95, %cst_28 [1] : vector<8x64xi32> to vector<8xi32>
    %97 = vector.shape_cast %96 : vector<8xi32> to vector<8x1xi32>
    %98 = vector.broadcast %97 : vector<8x1xi32> to vector<8x64xi32>
    %99 = arith.cmpi eq, %1, %98 : vector<8x64xi32>
    %100 = arith.extui %99 : vector<8x64xi1> to vector<8x64xi32>
    %101 = arith.sitofp %100 : vector<8x64xi32> to vector<8x64xf32>
    %cst_29 = arith.constant 0.000000e+00 : f32
    %102 = vector.broadcast %cst_29 : f32 to vector<8x64xf32>
    %103 = arith.cmpf ogt, %101, %102 : vector<8x64xf32>
    %cst_30 = arith.constant 0x7F800000 : f32
    %104 = vector.broadcast %cst_30 : f32 to vector<8x64xf32>
    %105 = arith.select %103, %104, %89 : vector<8x64xi1>, vector<8x64xf32>
    %cst_31 = arith.constant dense<0x7F800000> : vector<8xf32>
    %106 = vector.multi_reduction <minimumf>, %105, %cst_31 [1] : vector<8x64xf32> to vector<8xf32>
    %107 = vector.shape_cast %106 : vector<8xf32> to vector<8x1xf32>
    %108 = vector.broadcast %107 : vector<8x1xf32> to vector<8x64xf32>
    %109 = arith.cmpf ole, %105, %108 : vector<8x64xf32>
    %c64_i32_32 = arith.constant 64 : i32
    %110 = vector.broadcast %c64_i32_32 : i32 to vector<8x64xi32>
    %111 = arith.select %109, %1, %110 : vector<8x64xi1>, vector<8x64xi32>
    %cst_33 = arith.constant dense<2147483647> : vector<8xi32>
    %112 = vector.multi_reduction <minsi>, %111, %cst_33 [1] : vector<8x64xi32> to vector<8xi32>
    %113 = vector.shape_cast %112 : vector<8xi32> to vector<8x1xi32>
    %114 = vector.broadcast %113 : vector<8x1xi32> to vector<8x64xi32>
    %115 = arith.cmpi eq, %1, %114 : vector<8x64xi32>
    %116 = arith.extui %115 : vector<8x64xi1> to vector<8x64xi32>
    %117 = arith.sitofp %116 : vector<8x64xi32> to vector<8x64xf32>
    %118 = tpu.concatenate %69, %85, %101, %117 in 0 : vector<8x64xf32>, vector<8x64xf32>, vector<8x64xf32>, vector<8x64xf32> -> vector<32x64xf32>
    %cst_34 = arith.constant dense<0.000000e+00> : vector<32x16xf32>
    %119 = tpu.matmul %118, %8, %cst_34 {dimension_numbers = #tpu.dot_dimension_numbers<[1], [0], [0], [1], [0, 0, 1, 1], [], []>} : vector<32x64xf32>, vector<64x16xf32>, vector<32x16xf32> -> vector<32x16xf32>
    %120 = vector.extract_strided_slice %119 {offsets = [0, 0], sizes = [8, 16], strides = [1, 1]} : vector<32x16xf32> to vector<8x16xf32>
    %121 = arith.subf %120, %21 : vector<8x16xf32>
    %122 = vector.extract_strided_slice %119 {offsets = [8, 0], sizes = [8, 16], strides = [1, 1]} : vector<32x16xf32> to vector<8x16xf32>
    %123 = arith.subf %122, %21 : vector<8x16xf32>
    %124 = vector.extract_strided_slice %119 {offsets = [16, 0], sizes = [8, 16], strides = [1, 1]} : vector<32x16xf32> to vector<8x16xf32>
    %125 = arith.subf %124, %21 : vector<8x16xf32>
    %126 = vector.extract_strided_slice %119 {offsets = [24, 0], sizes = [8, 16], strides = [1, 1]} : vector<32x16xf32> to vector<8x16xf32>
    %127 = arith.subf %126, %21 : vector<8x16xf32>
    %128 = tpu.concatenate %121, %21, %123, %21, %125, %21, %127, %21 in 1 : vector<8x16xf32>, vector<8x16xf32>, vector<8x16xf32>, vector<8x16xf32>, vector<8x16xf32>, vector<8x16xf32>, vector<8x16xf32>, vector<8x16xf32> -> vector<8x128xf32>
    %c0_35 = arith.constant 0 : index
    %c0_36 = arith.constant 0 : index
    %c0_37 = arith.constant 0 : index
    %129 = vector.load %arg5[%c0_35, %c0_36, %c0_37] : memref<1x8x128xf32, #tpu.memory_space<vmem>>, vector<1x8x128xf32>
    %130 = vector.shape_cast %129 : vector<1x8x128xf32> to vector<8x128xf32>
    %131 = vector.shape_cast %128 : vector<8x128xf32> to vector<1x8x128xf32>
    tpu.vector_store %arg5[%c0_35, %c0_36, %c0_37], %131 {strides = array<i32>} : memref<1x8x128xf32, #tpu.memory_space<vmem>>, vector<1x8x128xf32>,
    return
  }
  func.func @transform_0(%arg0: i32) -> (i32, i32, i32) {
    %c0_i32 = arith.constant 0 : i32
    %c0_i32_0 = arith.constant 0 : i32
    %c0_i32_1 = arith.constant 0 : i32
    return %arg0, %c0_i32, %c0_i32_0 : i32, i32, i32
  }
  func.func @transform_1(%arg0: i32) -> (i32, i32, i32) {
    %c0_i32 = arith.constant 0 : i32
    %c0_i32_0 = arith.constant 0 : i32
    %c0_i32_1 = arith.constant 0 : i32
    return %arg0, %c0_i32, %c0_i32_0 : i32, i32, i32
  }
  func.func @transform_2(%arg0: i32) -> (i32, i32, i32) {
    %c0_i32 = arith.constant 0 : i32
    %c0_i32_0 = arith.constant 0 : i32
    %c0_i32_1 = arith.constant 0 : i32
    return %arg0, %c0_i32, %c0_i32_0 : i32, i32, i32
  }
  func.func @transform_3(%arg0: i32) -> (i32, i32, i32) {
    %c0_i32 = arith.constant 0 : i32
    %c0_i32_0 = arith.constant 0 : i32
    %c0_i32_1 = arith.constant 0 : i32
    return %arg0, %c0_i32, %c0_i32_0 : i32, i32, i32
  }
  func.func @transform_4(%arg0: i32) -> (i32, i32, i32) {
    %c0_i32 = arith.constant 0 : i32
    %c0_i32_0 = arith.constant 0 : i32
    %c0_i32_1 = arith.constant 0 : i32
    return %arg0, %c0_i32, %c0_i32_0 : i32, i32, i32
  }
}

</mosaic_0001>

<bundles_post_ra>
// kernel: tpu_custom_call.1
= control target key start
LH: loop header
LB: loop body
LE: loop exit
PB: predicated region body
PF: predicated region fallthrough
CT: control target
= control target key end

     0   :  { %s2035_s0 = inlined_call_operand.hbm [shape: f32[2,64,3], index: 0, kind: input, shape index: {}]   ;;  %s2036_s1 = inlined_call_operand.hbm [shape: f32[2,3,64], index: 1, kind: input, shape index: {}]   ;;  %s2037_s2 = inlined_call_operand.hbm [shape: f32[2,64,16], index: 2, kind: input, shape index: {}]   ;;  %s2038_s3 = inlined_call_operand.hbm [shape: f32[2,8,3], index: 3, kind: output, shape index: {0}]   ;;  %s2039_s4 = inlined_call_operand.hbm [shape: f32[2,8,128], index: 4, kind: output, shape index: {1}]  }
   0x1   :  { %2043 = sst [smem:[#allocation15_spill]] %s2035_s0 }
   0x2   :  { %2044 = sst [smem:[#allocation16_spill]] %s2036_s1 }
   0x3   :  { %10 = vsyncpa [#allocation3], 0 }
   0x4   :  { %12 = vsyncpa [#allocation3 + $0x1], 0 }
   0x5   :  { %13 = vsyncpa [#allocation6], 0 }
   0x6   :  { %15 = vsyncpa [#allocation6 + $0x1], 0 }
   0x7   :  { %16 = vsyncpa [#allocation4], 0 }
   0x8   :  { %18 = vsyncpa [#allocation4 + $0x1], 0 }
   0x9   :  { %19 = vsyncpa [#allocation10], 0 }
   0xa   :  { %21 = vsyncpa [#allocation10 + $0x1], 0  ;;  %s1588_s15 = smov 0   ;;  %s1590_s16 = smov 0  }
   0xb   :  { %s1592_s17 = smov 0   ;;  %s1594_s18 = smov 0  }
   0xc LB: > { %s1609_s19 = sadd.s32 4294967295, %s1523_s18   ;;  %s1030_s20 = sadd.s32 4294967294, %s1523_s18   ;;  %s1523_s18 = sphi %s1594_s18, %s2064_s18   ;;  %s1519_s17 = sphi %s1592_s17, %s2063_s17   ;;  %s1515_s16 = sphi %s1590_s16, %s2062_s16   ;;  %s1511_s15 = sphi %s1588_s15, %s2061_s15  }
   0xd   : > { %s1613_s21 = sadd.s32 1, %s1523_s18   ;;  %s34_s22 = sadd.s32 1, %s1519_s17 }
   0xe   : > { %s31_s23 = ssub.s32 %s1523_s18, %s1613_s21  ;;  %p41_p0 = scmp.ne.s32.totalorder %s1519_s17, %s1515_s16 }
   0xf   : > { %p32_p1 = scmp.eq.s32.totalorder %s31_s23, 0  ;;  %p42_p2 = scmp.eq.s32.totalorder %s1523_s18, 0 }
  0x10   : > { %p47_p3 = scmp.ne.s32.totalorder %s1515_s16, %s1511_s15  ;;  %p48_p4 = scmp.eq.s32.totalorder %s1609_s19, 0 }
  0x11   : > { %s1625_s24 = scalar_select %p32_p1, %s1519_s17, %s34_s22  }
  0x12   : > { %p43_p5 = por %p42_p2, %p41_p0  ;;  %p1627_p6 = por %p48_p4, %p47_p3 }
  0x13   : > { %p123_p7 = scmp.eq.s32.totalorder %s1609_s19, 1  ;;  %p129_p8 = scmp.eq.s32.totalorder %s1030_s20, 1 }
  0x14   : > { %s2045_s25 = scalar_select %p1627_p6, 1, 0 }
  0x15   : > { %p1227_p10 = scmp.lt.s32.totalorder %s1523_s18, 2  ;;  %p1634_p11 = por %p123_p7, %p41_p0 }
  0x16   : > { %p1638_p12 = por %p129_p8, %p47_p3  ;;  %s1643_s28 = sand.u32 1, %s1519_s17  }
  0x17   : > { %s2046_s26 = scalar_select %p1634_p11, 1, 0 }
  0x18   : > { %s2047_s27 = scalar_select %p1638_p12, 1, 0 }
  0x19   : > { %p1645_p13 = pnand %p1227_p10, %p43_p5  ;;  %s1033_s30 = sshll.u32 %s1643_s28, 6 }
  0x1a   : > { %s196_s5 = sand.u32 1, %s1523_s18   ;;  %s1036_s6 = sshll.u32 %s1643_s28, 2 }
  0x1b   : > { %s1037_s7 = sshll.u32 %s1523_s18, 6  ;;  %s2049_s1 = sld [smem:[#allocation16_spill]] }
  0x1c   : > { %s200_s11 = scalar_lea.vmem [#allocation5], %s1036_s6  ;;  %s1662_s13 = scalar_lea.vmem [#allocation7], %s1033_s30 }
  0x1d   : > { %s207_s12 = sshll.u32 %s200_s11, 4  ;;  %s225_s14 = sshll.u32 %s1662_s13, 4  ;;  %s1658_s12 = int_to_ptr.vmem [resolvable:$true] %s207_s12  ;;  %s1697_s14 = int_to_ptr.vmem [resolvable:$true] %s225_s14 }
  0x1e   : > { %s1665_s20 = scalar_lea.sflag [#allocation6], %s196_s5  ;;  %p1671_p1 = pneg %p1645_p13 }
  0x21   : > { %s1656_s10 = scalar_lea.hbm %s2049_s1, %s1037_s7  ;;  %s1320_s8 = scalar_lea.hbm %s2049_s1, 128 }
  0x22   : > { %s1315_s22 = scalar_lea.hbm %s1656_s10, 64  ;;  %p1321_p4 = scmp.lt.u32.totalorder %s1656_s10, %s2049_s1 }
  0x23   : > { %p1316_p0 = scmp.ne.s32.totalorder %s1656_s10, %s1315_s22  ;;  %p1322_p5 = scmp.lt.u32.totalorder %s1320_s8, %s1315_s22 }
  0x24   : > { %p1324_p8 = scmp.lt.u32.totalorder %s1315_s22, %s1656_s10 }
  0x25   : > { %p1318_p2 = pnand %p1671_p1, %p1316_p0  ;;  %p1323_p7 = por %p1322_p5, %p1321_p4 }
  0x27   : > { %p1319_p3 = pneg %p1318_p2  ;;  %p1325_p10 = por %p1324_p8, %p1323_p7 }
  0x29   : > { %p1326_p9 = pnand %p1325_p10, %p1319_p3 }
  0x2b   : > { %1329 = shalt.err (!%p1326_p9)
}
  0x2c   : > { %s1330_s5 = scalar_lea.vmem %s1658_s12, 64  ;;  %s1541_s6 = smov [#allocation5]  }
  0x2d   : > { %p1331_p0 = scmp.ne.s32.totalorder %s1658_s12, %s1330_s5  ;;  %s1335_s7 = sshll.u32 %s1541_s6, 4  ;;  %s1336_s7 = int_to_ptr.vmem [resolvable:$false] %s1335_s7 }
  0x2e   : > { %s1337_s9 = scalar_lea.vmem %s1336_s7, 128  ;;  %p1338_p11 = scmp.lt.s32.totalorder %s1658_s12, %s1336_s7 }
  0x2f   : > { %p1333_p2 = pnand %p1331_p0, %p1671_p1  ;;  %p1339_p6 = scmp.lt.s32.totalorder %s1337_s9, %s1330_s5 }
  0x31   : > { %p1334_p12 = pneg %p1333_p2  ;;  %p1340_p4 = por %p1339_p6, %p1338_p11 }
  0x33   : > { %p1341_p5 = pnand %p1340_p4, %p1334_p12 }
  0x35   : > { %1344 = shalt.err (!%p1341_p5)
}
  0x36   : > { %1216 = dma.hbm_to_vmem [thread:$0]  (!%p1645_p13), %s1656_s10, 64, %s1658_s12, %s1665_s20  }
  0x37   : > { %p1041_p6 = scmp.ge.s32.totalorder %s1523_s18, 1  ;;  %p233_p9 = scmp.lt.s32.totalorder %s1523_s18, 3 }
  0x38   : > { %s2042_s22 = sshll.u32 %s1523_s18, 10  ;;  %s2052_s0 = sld [smem:[#allocation15_spill]] }
  0x39   : > { %p1702_p11 = pnand %p1041_p6, %p233_p9  ;;  %s179_s10 = scalar_lea.vmem [#allocation2], %s1033_s30 }
  0x3a   : > { %s186_s12 = sshll.u32 %s179_s10, 4  ;;  %s176_s13 = scalar_lea.sflag [#allocation3], %s1643_s28  ;;  %s1715_s12 = int_to_ptr.vmem [resolvable:$true] %s186_s12 }
  0x3b   : > { %s2051_s8 = scalar_select %p1702_p11, 1, 0 }
  0x3e   : > { %s1711_s6 = scalar_lea.hbm %s2052_s0, %s2042_s22  ;;  %s1350_s11 = scalar_lea.hbm %s2052_s0, 2048 }
  0x3f   : > { %s1345_s7 = scalar_lea.hbm %s1711_s6, 1024  ;;  %p1351_p8 = scmp.lt.u32.totalorder %s1711_s6, %s2052_s0 }
  0x40   : > { %p1346_p12 = scmp.ne.s32.totalorder %s1711_s6, %s1345_s7  ;;  %p1352_p10 = scmp.lt.u32.totalorder %s1350_s11, %s1345_s7 }
  0x41   : > { %p1354_p2 = scmp.lt.u32.totalorder %s1345_s7, %s1711_s6 }
  0x42   : > { %p1348_p3 = pnand %p1346_p12, %p1671_p1  ;;  %p1353_p0 = por %p1352_p10, %p1351_p8 }
  0x44   : > { %p1349_p7 = pneg %p1348_p3  ;;  %p1355_p4 = por %p1354_p2, %p1353_p0 }
  0x46   : > { %p1356_p5 = pnand %p1355_p4, %p1349_p7 }
  0x48   : > { %1359 = shalt.err (!%p1356_p5)
}
  0x49   : > { %s1360_s30 = scalar_lea.vmem %s1715_s12, 1024  ;;  %s1542_s1 = smov [#allocation2]  }
  0x4a   : > { %p1361_p6 = scmp.ne.s32.totalorder %s1715_s12, %s1360_s30  ;;  %s1365_s10 = sshll.u32 %s1542_s1, 4  ;;  %s1366_s10 = int_to_ptr.vmem [resolvable:$false] %s1365_s10 }
  0x4b   : > { %s1367_s22 = scalar_lea.vmem %s1366_s10, 2048  ;;  %p1368_p3 = scmp.lt.s32.totalorder %s1715_s12, %s1366_s10 }
  0x4c   : > { %p1363_p9 = pnand %p1361_p6, %p1671_p1  ;;  %p1369_p11 = scmp.lt.s32.totalorder %s1367_s22, %s1360_s30 }
  0x4e   : > { %p1364_p12 = pneg %p1363_p9  ;;  %p1370_p8 = por %p1369_p11, %p1368_p3 }
  0x50   : > { %p1371_p10 = pnand %p1370_p8, %p1364_p12 }
  0x52   : > { %1374 = shalt.err (!%p1371_p10)
}
  0x53   : > { %s1543_s7 = smov 128   ;;  %s1544_s9 = smov 8  }
  0x54   : > { %1213 = dma.hbm_to_vmem [thread:$0]  (!%p1645_p13), %s1711_s6, 1024, %s1715_s12, %s176_s13, %s1543_s7, %s1543_s7, %s1544_s9  }
  0x55   : > { %s2053_s11 = sshll.u32 %s1523_s18, 10  ;;  %s1380_s28 = scalar_lea.hbm %s2037_s2, 2048 }
  0x56   : > { %s1749_s1 = scalar_lea.hbm %s2037_s2, %s2053_s11 }
  0x57   : > { %s1375_s10 = scalar_lea.hbm %s1749_s1, 1024  ;;  %p1381_p2 = scmp.lt.u32.totalorder %s1749_s1, %s2037_s2 }
  0x58   : > { %p1376_p11 = scmp.ne.s32.totalorder %s1749_s1, %s1375_s10  ;;  %p1382_p4 = scmp.lt.u32.totalorder %s1380_s28, %s1375_s10 }
  0x59   : > { %p1384_p6 = scmp.lt.u32.totalorder %s1375_s10, %s1749_s1 }
  0x5a   : > { %p1378_p7 = pnand %p1376_p11, %p1671_p1  ;;  %p1383_p5 = por %p1382_p4, %p1381_p2 }
  0x5c   : > { %p1379_p0 = pneg %p1378_p7  ;;  %p1385_p9 = por %p1384_p6, %p1383_p5 }
  0x5e   : > { %p1386_p12 = pnand %p1385_p9, %p1379_p0 }
  0x60   : > { %1389 = shalt.err (!%p1386_p12)
}
  0x61   : > { %s1390_s13 = scalar_lea.vmem %s1697_s14, 1024  ;;  %s1545_s0 = smov [#allocation7]  }
  0x62   : > { %p1391_p3 = scmp.ne.s32.totalorder %s1697_s14, %s1390_s13  ;;  %s1395_s11 = sshll.u32 %s1545_s0, 4  ;;  %s1396_s11 = int_to_ptr.vmem [resolvable:$false] %s1395_s11 }
  0x63   : > { %s1397_s5 = scalar_lea.vmem %s1396_s11, 2048  ;;  %p1398_p11 = scmp.lt.s32.totalorder %s1697_s14, %s1396_s11 }
  0x64   : > { %p1393_p8 = pnand %p1391_p3, %p1671_p1  ;;  %p1399_p7 = scmp.lt.s32.totalorder %s1397_s5, %s1390_s13 }
  0x66   : > { %p1394_p10 = pneg %p1393_p8  ;;  %p1400_p2 = por %p1399_p7, %p1398_p11 }
  0x68   : > { %p1401_p4 = pnand %p1400_p2, %p1394_p10 }
  0x6a   : > { %1404 = shalt.err (!%p1401_p4)
}
  0x6b   : > { %1219 = dma.hbm_to_vmem [thread:$0]  (!%p1645_p13), %s1749_s1, 1024, %s1697_s14, %s1665_s20, %s1543_s7, %s1543_s7, %s1544_s9  }
  0x6c   : > { %p2054_p1 = scmp.ne.s32.totalorder %s2051_s8, 0 }
  0x6d   : > { %s1779_s23 = sand.u32 (!%p2054_p1), 1, %s1515_s16   ;;  %p2055_p0 = scmp.ne.s32.totalorder (!%p2054_p1), %s2045_s25, 0 }
  0x6e   : > { %237 = sbr.rel (%p2054_p1) target bundleno = 2926 (0xb6e), region = 32  ;;  %s1042_s30 = sshll.u32 (!%p2054_p1), %s1779_s23, 6 }
  0x6f   : > { %s240_s10 = scalar_lea.sflag (!%p2054_p1), [#allocation3], %s1779_s23  ;;  %s243_s22 = scalar_lea.vmem (!%p2054_p1), [#allocation2], %s1042_s30 }
  0x75   : > { %1494 = dma.done.wait (%p2055_p0), %s240_s10, 1024  }
  0x76   : > { %1496 = vsyncadd (%p2055_p0), %s240_s10, 4294966272  ;;  %s248_s29 = sand.u32 1, %s1609_s19   ;;  %s1043_s14 = sshll.u32 %s1779_s23, 2 }
  0x77   : > { %s249_s20 = scalar_lea.sflag [#allocation6], %s248_s29  ;;  %s252_s8 = scalar_lea.vmem [#allocation5], %s1043_s14 }
  0x78   : > { %1498 = dma.done.wait (%p2055_p0), %s249_s20, 1088  }
  0x79   : > { %1500 = vsyncadd (%p2055_p0), %s249_s20, 4294966208  ;;  %s1045_s7 = sshll.u32 %s1779_s23, 3  ;;  %v301_v0 = vlaneseq  ;;  %v1798_v3 = vld [vmem:[%s243_s22] sm:$0xff]  ;;  %v1800_v4 = vld [vmem:[%s243_s22 + $0x8] sm:$0xff]  ;;  %s261_s25 = scalar_lea.vmem [#allocation7], %s1042_s30  ;;  %v1836_v20 = vmov 0  }
  0x7a   : > { %v1802_v5 = vld [vmem:[%s243_s22 + $0x10] sm:$0xff]  ;;  %v1804_v6 = vld [vmem:[%s243_s22 + $0x18] sm:$0xff]  ;;  %v1806_v7 = vld [vmem:[%s243_s22 + $0x20] sm:$0xff]  ;;  %s1832_s9 = scalar_lea.vmem [#allocation8], %s1045_s7  ;;  %s1834_s1 = scalar_lea.vmem [#allocation9], %s1045_s7 }
  0x7b   : > { %v1794_v1 = vand.u32 127, %v301_v0  ;;  %v1796_v2 = vshrl.u32 %v301_v0, 7  ;;  %v1808_v8 = vld [vmem:[%s243_s22 + $0x28] sm:$0xff]  ;;  %v1810_v9 = vld [vmem:[%s243_s22 + $0x30] sm:$0xff]  ;;  %v1812_v10 = vld [vmem:[%s243_s22 + $0x38] sm:$0xff]  ;;  %s1838_s28 = smov 0  }
  0x7c   : > { %v1814_v11 = vld [vmem:[%s252_s8] sm:$0x7]  ;;  %v1816_v12 = vld [vmem:[%s261_s25] sm:$0xff]  ;;  %v1818_v13 = vld [vmem:[%s261_s25 + $0x8] sm:$0xff]  ;;  %v1840_v21 = vmov 1e+10  }
  0x7d   : > { %v1820_v14 = vld [vmem:[%s261_s25 + $0x10] sm:$0xff]  ;;  %v1822_v15 = vld [vmem:[%s261_s25 + $0x18] sm:$0xff]  ;;  %v1824_v16 = vld [vmem:[%s261_s25 + $0x20] sm:$0xff]  ;;  %s1842_s6 = smov 0  }
  0x7e   : > { %v1826_v17 = vld [vmem:[%s261_s25 + $0x28] sm:$0xff]  ;;  %v1828_v18 = vld [vmem:[%s261_s25 + $0x30] sm:$0xff]  ;;  %v1830_v19 = vld [vmem:[%s261_s25 + $0x38] sm:$0xff] }
  0x7f LB: >> { %v331_v22 = vstv %s1539_s6  ;;  %v333_v23 = vstv %s1531_s28  ;;  %vm339_vm0 = vcmask 518144   ;;  %vm353_vm3 = vcmask 516096   ;;  %s327_s6 = sadd.s32 1, %s1539_s6   ;;  %s1539_s6 = sphi %s1842_s6, %s327_s6   ;;  %v1535_v21 = vphi %v1840_v21, %v352_v21   ;;  %s1531_s28 = sphi %s1838_s28, %s1199_s28   ;;  %v1527_v20 = vphi %v1836_v20, %v2057_v20  }
  0x80   : >> { %vm332_vm1 = vcmp.eq.s32.totalorder %v1796_v2, %v331_v22  ;;  %vm335_vm2 = vcmp.eq.s32.totalorder %v1794_v1, %v333_v23  ;;  %p324_p13 = scmp.ge.s32.totalorder %s327_s6, 8  }
  0x81   : >> { %v338_v24 = vsel %vm335_vm2, %v1814_v11, 0.0  ;;  %v1854_v20 = vsel %vm332_vm1, %v333_v23, %v1527_v20   ;;  %v1157_v62 = vpack.c.bf16 (%p324_p13), %v1800_v4, %v1798_v3  ;;  %v1546_v63 = vmov (%p324_p13), 0.0|0.0   ;;  %s1551_s13 = smov (%p324_p13), 127   ;;  %s1553_s0 = smov (%p324_p13), 126  }
  0x82   : >> { %v2056_v25 = vmov %v1854_v20  ;;  %v340_v26 = vsel %vm339_vm0, %v338_v24, 0.0  ;;  %1156 = vmatprep.subr.bf16.mxu1 (%p324_p13), %v1546_v63  ;;  %v1160_v0 = vpack.c.bf16 (%p324_p13), %v1804_v6, %v1802_v5  ;;  %vm1547_vm9 = vmmov (%p324_p13), 0   ;;  %s1554_s11 = smov (%p324_p13), 16   ;;  %s1555_s5 = smov (%p324_p13), 32  }
  0x83   : >> { %341 = vadd.xlane.f32.xlu0 %v340_v26  ;;  %v2057_v20 = vmov %v2056_v25  ;;  %1158 = vmatpush3.bf16.msra.mxu1 (%p324_p13), %v1157_v62  ;;  %v1548_v22 = vmov (%p324_p13), 0.0   ;;  %v1163_v3 = vpack.c.bf16 (%p324_p13), %v1808_v8, %v1806_v7  ;;  %v1166_v4 = vpack.c.bf16 (%p324_p13), %v1812_v10, %v1810_v9  ;;  %s1556_s30 = smov (%p324_p13), 48   ;;  %s1557_s10 = smov (%p324_p13), 80  }
  0x84   : > { %1112 = vmatprep.mubr.msk.f32.mxu1 (%p324_p13), %vm1547_vm9, %v1548_v22  ;;  %1159 = vmatprep.subr.bf16.mxu1 (%p324_p13), %v1546_v63  ;;  %vm392_vm10 = vcmp.eq.s32.totalorder (%p324_p13), %v1794_v1, %v2056_v25  ;;  %vm395_vm11 = vcmask (%p324_p13), 523264   ;;  %v1550_v6 = vmov (%p324_p13), 2   ;;  %vm539_vm12 = vcmask (%p324_p13), 23552   ;;  %s1558_s22 = smov (%p324_p13), 112   ;;  %s1060_s29 = sshll.u32 (%p324_p13), %s1609_s19, 7 }
  0x85   : > { %v1887_v5 = vsel (%p324_p13), %vm392_vm10, 1.0, %v1548_v22  ;;  %1312 = vset.pattern.permute.xlu0 (%p324_p13), %v1550_v6  ;;  %v1552_v10 = vmov (%p324_p13), 1   ;;  %v541_v26 = vmul.f32 (%p324_p13), %v1814_v11, %v1814_v11  ;;  %s1957_s8 = scalar_lea.hbm (%p324_p13), %s2038_s3, %s1060_s29  ;;  %s858_s7 = sshll.u32 (%p324_p13), %s1832_s9, 4  ;;  %s859_s7 = int_to_ptr.vmem [resolvable:$true] %s858_s7 }
  0x86   : > { %s840_s25 = scalar_lea.sflag (%p324_p13), [#allocation4], %s1779_s23  ;;  %p2058_p6 = scmp.ne.s32.totalorder (%p324_p13), %s2046_s26, 0 }
  0x87   : > { %1161 = vmatpush3.bf16.msra.mxu1 (%p324_p13), %v1160_v0  ;;  %s1559_s6 = smov (%p324_p13), [#allocation8]  }
  0x88   : > { %1162 = vmatprep.subr.bf16.mxu1 (%p324_p13), %v1546_v63 }
  0x8b   : > { %1164 = vmatpush3.bf16.msra.mxu1 (%p324_p13), %v1163_v3 }
  0x8c   : > { %1165 = vmatprep.subr.bf16.mxu1 (%p324_p13), %v1546_v63 }
  0x8f   : > { %1167 = vmatpush3.bf16.msra.mxu1 (%p324_p13), %v1166_v4 }
  0x90   : > { %1168 = vmatprep.subr.bf16.mxu1 (%p324_p13), %v1546_v63 }
  0x92   : > { %1113 = vmatmul.mubr.msk.f32.vlgmr.msra.gmra.mrb[0].mxu1 (%p324_p13), %vm395_vm11, %v1887_v5 }
  0x93   : > { %1131 = vmatprep.mubr.msk.f32.mxu1 (%p324_p13), %vm1547_vm9, %v1548_v22 }
 0x110   : >> { %v342_v27 = vpop.xlane.xlu0 %341 }
 0x111   : >> { %v343_v28 = vsub.f32 %v1814_v11, %v342_v27 }
 0x113   : >> { %v344_v29 = vmul.f32 %v343_v28, %v343_v28  ;;  %v575_v28 = vsub.s32 (%p324_p13), 1, %v1796_v2 }
 0x115   : >> { %v346_v30 = vrot.slane %v344_v29, 1  ;;  %v349_v32 = vrot.slane %v344_v29, 2 }
 0x117   : >> { %v348_v31 = vadd.f32 %v346_v30, %v344_v29  ;;  %v566_v29 = vsub.s32 (%p324_p13), 0, %v1796_v2  ;;  %v585_v30 = vsub.s32 (%p324_p13), 2, %v1796_v2 }
 0x119   : >> { %v351_v33 = vadd.f32 %v349_v32, %v348_v31  ;;  %v543_v31 = vrot.slane (%p324_p13), %v541_v26, 1  ;;  %v576_v32 = vrot.slane (%p324_p13), %v1814_v11, %v575_v28 }
 0x11b   : >> { %v352_v21 = vmin.f32 %v1535_v21, %v351_v33  }
 0x11d   : >> { %v354_v34 = vsel %vm353_vm3, %v352_v21, -inf }
 0x11e   : >> { %355 = vmax.xlane.f32.xlu0 %v354_v34  ;;  %v567_v34 = vrot.slane (%p324_p13), %v1814_v11, %v566_v29 }
 0x165   : > { %v465_v7 = vpop.f32.mrb[0].mxu1 (%p324_p13) }
 0x166   : > { %v1114_v8 = vpop.f32.mrb[1].mxu1 (%p324_p13)  ;;  %v549_v9 = vmul.f32 (%p324_p13), %v465_v7, %v465_v7  ;;  %540 = vst.msk [vmem:[%s1832_s9] sm:$0xff] (%p324_p13), %vm539_vm12, %v465_v7 }
 0x168   : > { %551 = vrot.lane.b32.xlu0 (%p324_p13), %v549_v9, %s1551_s13 }
 0x16c   : > { %555 = vrot.lane.b32.xlu0 (%p324_p13), %v549_v9, %s1553_s0 }
 0x170   : > { %580 = vperm.xlu0 (%p324_p13), %1312, %v465_v7  }
 0x1ab   : >> { %v356_v35 = vpop.xlane.xlu0 %355 }
 0x1ac   : >> { %v357_v36 = vrot.slane %v356_v35, 4 }
 0x1ae   : >> { %v358_v37 = vmax.f32 %v356_v35, %v357_v36  ;;  %v586_v35 = vrot.slane (%p324_p13), %v1814_v11, %v585_v30  ;;  %v545_v36 = vadd.f32 (%p324_p13), %v543_v31, %v541_v26 }
 0x1b0   : >> { %v359_v38 = vrot.slane %v358_v37, 2 }
 0x1b2   : >> { %v360_v39 = vmax.f32 %v358_v37, %v359_v38  ;;  %v546_v37 = vrot.slane (%p324_p13), %v541_v26, 2 }
 0x1b4   : >> { %v361_v40 = vrot.slane %v360_v39, 1 }
 0x1b6   : >> { %v362_v41 = vmax.f32 %v360_v39, %v361_v40 }
 0x1b8   : >> { %1196 = vpush %v362_v41 }
 0x1da   : > { %v552_v20 = vpop.permute.xlu0 (%p324_p13), %551 }
 0x1db   : > { %v554_v23 = vadd.f32 (%p324_p13), %v552_v20, %v549_v9  ;;  %v1172_v20 = vpack.c.bf16 (%p324_p13), %v1822_v15, %v1820_v14 }
 0x1de   : > { %v556_v24 = vpop.permute.xlu0 (%p324_p13), %555 }
 0x1df   : > { %v558_v25 = vadd.f32 (%p324_p13), %v556_v24, %v554_v23  ;;  %v1175_v23 = vpack.c.bf16 (%p324_p13), %v1826_v17, %v1824_v16  ;;  %v1178_v24 = vpack.c.bf16 (%p324_p13), %v1830_v19, %v1828_v18 }
 0x1e9   : >> { %s1197_s12 = spop %1196 }
 0x1ea   : >> { %v364_v42 = vstv %s1197_s12  ;;  %s1409_s12 = sshll.u32 (%p324_p13), %s1559_s6, 4  ;;  %s1410_s12 = int_to_ptr.vmem [resolvable:$false] %s1409_s12 }
 0x1eb   : >> { %vm365_vm4 = vcmp.ge.f32.partialorder %v352_v21, %v364_v42  ;;  %v1549_v21 = vmov (%p324_p13), 0   ;;  %v548_v42 = vadd.f32 (%p324_p13), %v546_v37, %v545_v36  ;;  %s1411_s13 = scalar_lea.vmem (%p324_p13), %s1410_s12, 256  ;;  %p1412_p3 = scmp.lt.s32.totalorder (%p324_p13), %s859_s7, %s1410_s12 }
 0x1ec   : >> { %v366_v43 = vsel %vm365_vm4, %v1794_v1, 64  ;;  %1310 = vset.pattern.permute.xlu1 (%p324_p13), %v1549_v21  ;;  %1314 = vset.pattern.permute.xlu0 (%p324_p13), %v1549_v21 }
 0x1ed   : >> { %v367_v44 = vsel %vm353_vm3, %v366_v43, 2147483647 }
 0x1ee   : >> { %v369_v45 = vshra.s32 %v367_v44, 16  ;;  %v368_v47 = vand.u32 65535, %v367_v44 }
 0x1ef   : > { %v581_v38 = vpop.permute.xlu0 (%p324_p13), %580 }
 0x1f0   : >> { %v371_v46 = vcvt.s32.f32 %v369_v45  ;;  %v370_v49 = vcvt.s32.f32 %v368_v47  ;;  %v587_v41 = vmul.f32 (%p324_p13), %v586_v35, %v581_v38  ;;  %v597_v45 = vrot.slane (%p324_p13), %v548_v42, %v566_v29 }
 0x1f2   : >> { %372 = vmin.xlane.f32.xlu1 %v371_v46 }
 0x27f   : >> { %v373_v48 = vpop.xlane.xlu1 %372 }
 0x280   : >> { %vm374_vm5 = vcmp.eq.f32.partialorder %v371_v46, %v373_v48  ;;  %v379_v51 = vcvt.f32.s32 %v373_v48 }
 0x281   : >> { %v375_v50 = vsel %vm374_vm5, %v370_v49, inf }
 0x282   : >> { %376 = vmin.xlane.f32.xlu1 %v375_v50  ;;  %v380_v53 = vshll.u32 %v379_v51, 16 }
 0x293   : > { %561 = vperm.xlu1 (%p324_p13), %1310, %v465_v7  }
 0x297   : > { %1311 = vset.pattern.permute.xlu1 (%p324_p13), %v1552_v10  ;;  %v1169_v10 = vpack.c.bf16 (%p324_p13), %v1818_v13, %v1816_v12 }
 0x298   : > { %570 = vperm.xlu1 (%p324_p13), %1311, %v465_v7  }
 0x299   : > { %1181 = vmatprep.subr.bf16.mxu0 (%p324_p13), %v1169_v10  ;;  %1170 = vmatpush3.bf16.msra.mxu1 (%p324_p13), %v1169_v10 }
 0x29a   : > { %1183 = vmatpush3.bf16.msra.mxu0 (%p324_p13), %v1169_v10  ;;  %1171 = vmatprep.subr.bf16.mxu1 (%p324_p13), %v1546_v63 }
 0x29b   : > { %1185 = vmatprep.subr.bf16.mxu0 (%p324_p13), %v1172_v20 }
 0x29c   : > { %1313 = vset.pattern.permute.xlu1 (%p324_p13), %v1549_v21 }
 0x29d   : > { %591 = vperm.xlu1 (%p324_p13), %1313, %v558_v25   ;;  %1173 = vmatpush3.bf16.msra.mxu1 (%p324_p13), %v1172_v20 }
 0x29e   : > { %1187 = vmatpush3.bf16.msra.mxu0 (%p324_p13), %v1172_v20  ;;  %1174 = vmatprep.subr.bf16.mxu1 (%p324_p13), %v1546_v63 }
 0x29f   : > { %1189 = vmatprep.subr.bf16.mxu0 (%p324_p13), %v1175_v23 }
 0x2a1   : > { %1176 = vmatpush3.bf16.msra.mxu1 (%p324_p13), %v1175_v23 }
 0x2a2   : > { %1191 = vmatpush3.bf16.msra.mxu0 (%p324_p13), %v1175_v23  ;;  %1177 = vmatprep.subr.bf16.mxu1 (%p324_p13), %v1546_v63 }
 0x2a3   : > { %1193 = vmatprep.subr.bf16.mxu0 (%p324_p13), %v1178_v24 }
 0x2a5   : > { %1179 = vmatpush3.bf16.msra.mxu1 (%p324_p13), %v1178_v24 }
 0x2a6   : > { %1195 = vmatpush3.bf16.msra.mxu0 (%p324_p13), %v1178_v24 }
 0x2a8   : > { %1132 = vmatmul.mubr.msk.f32.vlgmr.msra.gmra.mrb[2].mxu1 (%p324_p13), %vm395_vm11, %v1887_v5 }
 0x30f   : >> { %v377_v52 = vpop.xlane.xlu1 %376 }
 0x310   : >> { %v378_v54 = vcvt.f32.s32 %v377_v52 }
 0x312   : >> { %v381_v55 = vadd.s32 %v380_v53, %v378_v54 }
 0x313   : > { %v562_v27 = vpop.permute.xlu1 (%p324_p13), %561 }
 0x314   : >> { %v382_v56 = vrot.slane %v381_v55, 4  ;;  %v568_v40 = vmul.f32 (%p324_p13), %v567_v34, %v562_v27 }
 0x316   : >> { %vm383_vm6 = vcmp.lt.s32.totalorder %v381_v55, %v382_v56 }
 0x317   : >> { %v384_v57 = vsel %vm383_vm6, %v381_v55, %v382_v56  ;;  %v571_v33 = vpop.permute.xlu1 (%p324_p13), %570 }
 0x318   : >> { %v385_v58 = vrot.slane %v384_v57, 2  ;;  %v577_v39 = vmul.f32 (%p324_p13), %v576_v32, %v571_v33 }
 0x31a   : >> { %vm386_vm7 = vcmp.lt.s32.totalorder %v384_v57, %v385_v58  ;;  %v578_v43 = vadd.f32 (%p324_p13), %v577_v39, %v568_v40 }
 0x31b   : >> { %v387_v59 = vsel %vm386_vm7, %v384_v57, %v385_v58 }
 0x31c   : >> { %v388_v60 = vrot.slane %v387_v59, 1  ;;  %v588_v44 = vadd.f32 (%p324_p13), %v587_v41, %v578_v43  ;;  %v592_v46 = vpop.permute.xlu1 (%p324_p13), %591 }
 0x31d   : > { %v598_v47 = vadd.f32 (%p324_p13), %v597_v45, %v592_v46 }
 0x31e   : >> { %vm389_vm8 = vcmp.lt.s32.totalorder %v387_v59, %v388_v60  ;;  %v599_v2 = vmul.f32 (%p324_p13), 2.0, %v588_v44 }
 0x31f   : >> { %v390_v61 = vsel %vm389_vm8, %v387_v59, %v388_v60 }
 0x320   : >> { %1198 = vpush %v390_v61  ;;  %v600_v48 = vsub.f32 (%p324_p13), %v598_v47, %v599_v2 }
 0x322   : > { %v601_v49 = vsel (%p324_p13), %vm395_vm11, %v600_v48, inf }
 0x323   : > { %602 = vmin.xlane.f32.xlu1 (%p324_p13), %v601_v49 }
 0x34b   : > { %326 = sbr.rel (!%p324_p13) target bundleno = 127 (0x7f), region = 125 }
 0x351   : >> { %s1199_s28 = spop %1198  }
 0x352   : > { %s1405_s28 = scalar_lea.vmem %s859_s7, 128 }
 0x353   : > { %p1406_p5 = scmp.ne.s32.totalorder %s859_s7, %s1405_s28  ;;  %p1413_p8 = scmp.lt.s32.totalorder %s1411_s13, %s1405_s28 }
 0x355   : > { %p1407_p9 = pnand %p1406_p5, %p2058_p6  ;;  %p1414_p10 = por %p1413_p8, %p1412_p3 }
 0x357   : > { %p1408_p12 = pneg %p1407_p9 }
 0x359   : > { %p1415_p11 = pnand %p1414_p10, %p1408_p12 }
 0x37b   : > { %v1929_v19 = vpop.f32.mrb[2].mxu1 }
 0x37c   : > { %v1133_v29 = vpop.f32.mrb[3].mxu1 }
 0x3b0   : > { %v603_v50 = vpop.xlane.xlu1 %602 }
 0x3b1   : > { %vm604_vm13 = vcmp.le.f32.partialorder %v600_v48, %v603_v50 }
 0x3b2   : > { %v605_v11 = vsel %vm604_vm13, %v1794_v1, 64 }
 0x3b3   : > { %v606_v51 = vsel %vm395_vm11, %v605_v11, 2147483647 }
 0x3b4   : > { %v608_v52 = vshra.s32 %v606_v51, 16  ;;  %v607_v54 = vand.u32 65535, %v606_v51 }
 0x3b6   : > { %v610_v53 = vcvt.s32.f32 %v608_v52  ;;  %v609_v56 = vcvt.s32.f32 %v607_v54 }
 0x3b8   : > { %611 = vmin.xlane.f32.xlu0 %v610_v53 }
 0x445   : > { %v612_v55 = vpop.xlane.xlu0 %611 }
 0x446   : > { %vm613_vm14 = vcmp.eq.f32.partialorder %v610_v53, %v612_v55  ;;  %v618_v58 = vcvt.f32.s32 %v612_v55 }
 0x447   : > { %v614_v57 = vsel %vm613_vm14, %v609_v56, inf }
 0x448   : > { %615 = vmin.xlane.f32.xlu0 %v614_v57  ;;  %v619_v60 = vshll.u32 %v618_v58, 16 }
 0x4d5   : > { %v616_v59 = vpop.xlane.xlu0 %615 }
 0x4d6   : > { %v617_v61 = vcvt.f32.s32 %v616_v59 }
 0x4d8   : > { %v620_v62 = vadd.s32 %v619_v60, %v617_v61 }
 0x4da   : > { %vm621_vm15 = vcmp.eq.s32.totalorder %v1794_v1, %v620_v62 }
 0x4db   : > { %v1050_v0 = vsel %vm621_vm15, 1.0, %v1548_v22 }
 0x4dc   : > { %vm624_vm0 = vcmp.gt.f32.partialorder %v1050_v0, 0.0  ;;  %1150 = vmatprep.mubr.msk.f32.mxu0 %vm395_vm11, %v1050_v0 }
 0x4dd   : > { %v625_v21 = vsel %vm624_vm0, inf, %v600_v48 }
 0x4de   : > { %v626_v3 = vsel %vm395_vm11, %v625_v21, inf }
 0x4df   : > { %627 = vmin.xlane.f32.xlu1 %v626_v3 }
 0x56c   : > { %v628_v4 = vpop.xlane.xlu1 %627 }
 0x56d   : > { %vm629_vm1 = vcmp.le.f32.partialorder %v625_v21, %v628_v4 }
 0x56e   : > { %v630_v6 = vsel %vm629_vm1, %v1794_v1, 64 }
 0x56f   : > { %v631_v7 = vsel %vm395_vm11, %v630_v6, 2147483647 }
 0x570   : > { %v633_v8 = vshra.s32 %v631_v7, 16  ;;  %v632_v12 = vand.u32 65535, %v631_v7 }
 0x572   : > { %v635_v9 = vcvt.s32.f32 %v633_v8  ;;  %v634_v14 = vcvt.s32.f32 %v632_v12 }
 0x574   : > { %636 = vmin.xlane.f32.xlu0 %v635_v9 }
 0x601   : > { %v637_v13 = vpop.xlane.xlu0 %636 }
 0x602   : > { %vm638_vm2 = vcmp.eq.f32.partialorder %v635_v9, %v637_v13  ;;  %v643_v16 = vcvt.f32.s32 %v637_v13 }
 0x603   : > { %v639_v15 = vsel %vm638_vm2, %v634_v14, inf }
 0x604   : > { %640 = vmin.xlane.f32.xlu1 %v639_v15  ;;  %v644_v25 = vshll.u32 %v643_v16, 16 }
 0x691   : > { %v641_v17 = vpop.xlane.xlu1 %640 }
 0x692   : > { %v642_v26 = vcvt.f32.s32 %v641_v17 }
 0x694   : > { %v645_v63 = vadd.s32 %v644_v25, %v642_v26 }
 0x696   : > { %vm646_vm3 = vcmp.eq.s32.totalorder %v1794_v1, %v645_v63 }
 0x697   : > { %v1051_v27 = vsel %vm646_vm3, 1.0, %v1548_v22 }
 0x698   : > { %1151 = vmatmul.mubr.msk.f32.vlgmr.msra.gmra.mrb[0].mxu0 %vm395_vm11, %v1051_v27  ;;  %vm649_vm4 = vcmp.gt.f32.partialorder %v1051_v27, 0.0 }
 0x699   : > { %v650_v28 = vsel %vm649_vm4, inf, %v625_v21 }
 0x69a   : > { %v651_v18 = vsel %vm395_vm11, %v650_v28, inf }
 0x69b   : > { %652 = vmin.xlane.f32.xlu0 %v651_v18 }
 0x728   : > { %v653_v5 = vpop.xlane.xlu0 %652 }
 0x729   : > { %vm654_vm5 = vcmp.le.f32.partialorder %v650_v28, %v653_v5 }
 0x72a   : > { %v655_v30 = vsel %vm654_vm5, %v1794_v1, 64 }
 0x72b   : > { %v656_v31 = vsel %vm395_vm11, %v655_v30, 2147483647 }
 0x72c   : > { %v658_v32 = vshra.s32 %v656_v31, 16  ;;  %v657_v38 = vand.u32 65535, %v656_v31 }
 0x72e   : > { %v660_v33 = vcvt.s32.f32 %v658_v32  ;;  %v659_v40 = vcvt.s32.f32 %v657_v38 }
 0x730   : > { %661 = vmin.xlane.f32.xlu1 %v660_v33 }
 0x76b   : > { %v1152_v34 = vpop.f32.mrb[0].mxu0 }
 0x76c   : > { %v797_v35 = vsub.f32 %v1152_v34, %v1929_v19  ;;  %v1934_v36 = vpop.f32.mrb[1].mxu0 }
 0x76d   : > { %v796_v37 = vsub.f32 %v1934_v36, %v1929_v19 }
 0x7bd   : > { %v662_v39 = vpop.xlane.xlu1 %661 }
 0x7be   : > { %vm663_vm6 = vcmp.eq.f32.partialorder %v660_v33, %v662_v39  ;;  %v668_v42 = vcvt.f32.s32 %v662_v39 }
 0x7bf   : > { %v664_v41 = vsel %vm663_vm6, %v659_v40, inf }
 0x7c0   : > { %665 = vmin.xlane.f32.xlu0 %v664_v41  ;;  %v669_v44 = vshll.u32 %v668_v42, 16 }
 0x84d   : > { %v666_v43 = vpop.xlane.xlu0 %665 }
 0x84e   : > { %v667_v45 = vcvt.f32.s32 %v666_v43 }
 0x850   : > { %v670_v46 = vadd.s32 %v669_v44, %v667_v45 }
 0x852   : > { %vm671_vm7 = vcmp.eq.s32.totalorder %v1794_v1, %v670_v46 }
 0x853   : > { %v1052_v2 = vsel %vm671_vm7, 1.0, %v1548_v22 }
 0x854   : > { %1153 = vmatprep.mubr.msk.f32.mxu0 %vm395_vm11, %v1052_v2  ;;  %vm674_vm8 = vcmp.gt.f32.partialorder %v1052_v2, 0.0 }
 0x855   : > { %v675_v47 = vsel %vm674_vm8, inf, %v650_v28 }
 0x856   : > { %v676_v48 = vsel %vm395_vm11, %v675_v47, inf }
 0x857   : > { %677 = vmin.xlane.f32.xlu1 %v676_v48 }
 0x8e4   : > { %v678_v49 = vpop.xlane.xlu1 %677 }
 0x8e5   : > { %vm679_vm9 = vcmp.le.f32.partialorder %v675_v47, %v678_v49 }
 0x8e6   : > { %v680_v50 = vsel %vm679_vm9, %v1794_v1, 64 }
 0x8e7   : > { %v681_v11 = vsel %vm395_vm11, %v680_v50, 2147483647 }
 0x8e8   : > { %v683_v51 = vshra.s32 %v681_v11, 16  ;;  %v682_v53 = vand.u32 65535, %v681_v11 }
 0x8ea   : > { %v685_v52 = vcvt.s32.f32 %v683_v51  ;;  %v684_v55 = vcvt.s32.f32 %v682_v53 }
 0x8ec   : > { %686 = vmin.xlane.f32.xlu0 %v685_v52 }
 0x902   : > { %801 = vrot.lane.b32.xlu0 %v1929_v19, %s1554_s11 }
 0x979   : > { %v687_v54 = vpop.xlane.xlu0 %686 }
 0x97a   : > { %vm688_vm10 = vcmp.eq.f32.partialorder %v685_v52, %v687_v54  ;;  %v693_v57 = vcvt.f32.s32 %v687_v54 }
 0x97b   : > { %v689_v56 = vsel %vm688_vm10, %v684_v55, inf }
 0x97c   : > { %690 = vmin.xlane.f32.xlu1 %v689_v56  ;;  %v694_v59 = vshll.u32 %v693_v57, 16 }
 0x98d   : > { %805 = vrot.lane.b32.xlu1 %v797_v35, %s1555_s5 }
 0x991   : > { %808 = vrot.lane.b32.xlu1 %v1929_v19, %s1556_s30 }
 0x995   : > { %815 = vrot.lane.b32.xlu1 %v1929_v19, %s1557_s10 }
 0x999   : > { %822 = vrot.lane.b32.xlu1 %v1929_v19, %s1558_s22 }
 0xa09   : > { %v691_v58 = vpop.xlane.xlu1 %690 }
 0xa0a   : > { %v692_v60 = vcvt.f32.s32 %v691_v58 }
 0xa0c   : > { %v695_v61 = vadd.s32 %v694_v59, %v692_v60 }
 0xa0e   : > { %vm696_vm12 = vcmp.eq.s32.totalorder %v1794_v1, %v695_v61 }
 0xa0f   : > { %v1053_v62 = vsel %vm696_vm12, 1.0, %v1548_v22 }
 0xa10   : > { %1154 = vmatmul.mubr.msk.f32.gmra.mrb[2].mxu0 %vm395_vm11, %v1053_v62 }
 0xa11   : > { %1418 = shalt.err (!%p1415_p11)
}
 0xa12   : > { %s1419_s9 = scalar_lea.hbm %s1957_s8, 128  ;;  %s1423_s5 = scalar_lea.hbm %s2038_s3, 256 }
 0xa13   : > { %p1420_p7 = scmp.ne.s32.totalorder %s1957_s8, %s1419_s9  ;;  %p1424_p1 = scmp.lt.u32.totalorder %s1957_s8, %s2038_s3 }
 0xa14   : > { %p1425_p0 = scmp.lt.u32.totalorder %s1423_s5, %s1419_s9  ;;  %p1427_p5 = scmp.lt.u32.totalorder %s1419_s9, %s1957_s8 }
 0xa15   : > { %p1421_p2 = pnand %p1420_p7, %p2058_p6 }
 0xa16   : > { %p1426_p13 = por %p1425_p0, %p1424_p1 }
 0xa17   : > { %p1422_p4 = pneg %p1421_p2 }
 0xa18   : > { %p1428_p9 = por %p1427_p5, %p1426_p13 }
 0xa1a   : > { %p1429_p12 = pnand %p1428_p9, %p1422_p4 }
 0xa1c   : > { %1432 = shalt.err (!%p1429_p12)
}
 0xa1d   : > { %1206 = dma.vmem_to_hbm [thread:$0]  (%p2058_p6), %s859_s7, 128, %s1957_s8, %s840_s25   ;;  %v806_v3 = vpop.permute.xlu1 %805  ;;  %vm825_vm13 = vcmask 130048   ;;  %v802_v4 = vpop.permute.xlu0 %801  ;;  %vm827_vm14 = vcmask 261120   ;;  %vm829_vm15 = vcmask 392192   ;;  %vm832_vm0 = vcmask 654336  }
 0xa1e   : > { %s1560_s22 = smov 64   ;;  %s1561_s14 = smov 96   ;;  %v826_v7 = vsel %vm825_vm13, %v796_v37, %v802_v4  ;;  %vm834_vm1 = vcmask 785408   ;;  %vm836_vm2 = vcmask 916480  }
 0xa1f   : > { %v828_v8 = vsel %vm827_vm14, %v826_v7, %v806_v3  ;;  %s871_s20 = sshll.u32 %s1834_s1, 4  ;;  %s1990_s25 = scalar_lea.hbm %s2039_s4, %s1060_s29  ;;  %s1992_s20 = int_to_ptr.vmem [resolvable:$true] %s871_s20 }
 0xa20   : > { %s845_s28 = scalar_lea.sflag [#allocation10], %s1779_s23  ;;  %s1433_s6 = scalar_lea.vmem %s1992_s20, 128 }
 0xa21   : > { %v809_v6 = vpop.permute.xlu1 %808  ;;  %p1434_p3 = scmp.ne.s32.totalorder %s1992_s20, %s1433_s6  ;;  %s1562_s12 = smov [#allocation9]  }
 0xa22   : > { %v830_v10 = vsel %vm829_vm15, %v828_v8, %v809_v6  ;;  %s1437_s19 = sshll.u32 %s1562_s12, 4  ;;  %s1438_s19 = int_to_ptr.vmem [resolvable:$false] %s1437_s19 }
 0xa23   : > { %p1435_p8 = pnand %p1434_p3, %p2058_p6  ;;  %s1439_s13 = scalar_lea.vmem %s1438_s19, 256 }
 0xa24   : > { %p1440_p11 = scmp.lt.s32.totalorder %s1992_s20, %s1438_s19  ;;  %p1441_p7 = scmp.lt.s32.totalorder %s1439_s13, %s1433_s6 }
 0xa25   : > { %v816_v9 = vpop.permute.xlu1 %815  ;;  %p1436_p10 = pneg %p1435_p8 }
 0xa26   : > { %p1442_p2 = por %p1441_p7, %p1440_p11 }
 0xa28   : > { %p1443_p4 = pnand %p1442_p2, %p1436_p10 }
 0xa29   : > { %v823_v14 = vpop.permute.xlu1 %822 }
 0xae3   : > { %v1155_v1 = vpop.f32.mrb[2].mxu0 }
 0xae4   : > { %v799_v22 = vsub.f32 %v1155_v1, %v1929_v19  ;;  %v787_v0 = vpop.f32.mrb[3].mxu0 }
 0xae5   : > { %v798_v21 = vsub.f32 %v787_v0, %v1929_v19 }
 0xae7   : > { %812 = vrot.lane.b32.xlu0 %v798_v21, %s1560_s22 }
 0xaeb   : > { %819 = vrot.lane.b32.xlu0 %v799_v22, %s1561_s14 }
 0xb59   : > { %v813_v20 = vpop.permute.xlu0 %812 }
 0xb5a   : > { %v831_v23 = vsel %vm395_vm11, %v830_v10, %v813_v20 }
 0xb5b   : > { %v833_v13 = vsel %vm832_vm0, %v831_v23, %v816_v9 }
 0xb5d   : > { %v820_v12 = vpop.permute.xlu0 %819 }
 0xb5e   : > { %v835_v15 = vsel %vm834_vm1, %v833_v13, %v820_v12 }
 0xb5f   : > { %v837_v24 = vsel %vm836_vm2, %v835_v15, %v823_v14 }
 0xb60   : > { %838 = vst [vmem:[%s1834_s1] sm:$0xff] %v837_v24 }
 0xb61   : > { %1446 = shalt.err (!%p1443_p4)
}
 0xb62   : > { %s1447_s23 = scalar_lea.hbm %s1990_s25, 128  ;;  %s1451_s9 = scalar_lea.hbm %s2039_s4, 256 }
 0xb63   : > { %p1448_p1 = scmp.ne.s32.totalorder %s1990_s25, %s1447_s23  ;;  %p1452_p5 = scmp.lt.u32.totalorder %s1990_s25, %s2039_s4 }
 0xb64   : > { %p1453_p9 = scmp.lt.u32.totalorder %s1451_s9, %s1447_s23  ;;  %p1455_p3 = scmp.lt.u32.totalorder %s1447_s23, %s1990_s25 }
 0xb65   : > { %p1449_p0 = pnand %p1448_p1, %p2058_p6 }
 0xb66   : > { %p1454_p12 = por %p1453_p9, %p1452_p5 }
 0xb67   : > { %p1450_p13 = pneg %p1449_p0 }
 0xb68   : > { %p1456_p8 = por %p1455_p3, %p1454_p12 }
 0xb6a   : > { %p1457_p10 = pnand %p1456_p8, %p1450_p13 }
 0xb6c   : > { %1460 = shalt.err (!%p1457_p10)
}
 0xb6d   : > { %1207 = dma.vmem_to_hbm [thread:$0]  (%p2058_p6), %s1992_s20, 128, %s1990_s25, %s845_s28  }
 0xb6e PF: > { %s883_s5 = sand.u32 1, %s1511_s15   ;;  %p2059_p11 = scmp.ne.s32.totalorder %s2047_s27, 0 }
 0xb6f   : > { %p2060_p7 = scmp.ge.s32.totalorder %s1523_s18, 2  ;;  %s884_s30 = scalar_lea.sflag [#allocation4], %s883_s5 }
 0xb71   : > { %p1221_p2 = pnand %p2060_p7, %p2059_p11 }
 0xb73   : > { %1502 = dma.done.wait (!%p1221_p2), %s884_s30, 128  }
 0xb74   : > { %1504 = vsyncadd (!%p1221_p2), %s884_s30, 4294967168  ;;  %s893_s10 = scalar_lea.sflag [#allocation10], %s883_s5 }
 0xb75   : > { %1506 = dma.done.wait (!%p1221_p2), %s893_s10, 128  }
 0xb76   : > { %1508 = vsyncadd (!%p1221_p2), %s893_s10, 4294967168  ;;  %p24_p6 = scmp.ge.s32.totalorder %s1613_s21, 4   ;;  %s2061_s15 = smov %s1515_s16 }
 0xb77   : > { %s2062_s16 = smov %s1519_s17  ;;  %s2063_s17 = smov %s1625_s24 }
 0xb78   : > { %s2064_s18 = smov %s1613_s21  ;;  %26 = sbr.rel (!%p24_p6) target bundleno = 12 (0xc), region = 136 }
 0xb7f   :  { %898 = vsyncpa [#allocation3], 1 }
 0xb80   :  { %900 = vsyncpa [#allocation3 + $0x1], 1 }
 0xb81   :  { %901 = vsyncpa [#allocation6], 1 }
 0xb82   :  { %903 = vsyncpa [#allocation6 + $0x1], 1 }
 0xb83   :  { %904 = vsyncpa [#allocation4], 1 }
 0xb84   :  { %906 = vsyncpa [#allocation4 + $0x1], 1 }
 0xb85   :  { %907 = vsyncpa [#allocation10], 1 }
 0xb86   :  { %909 = vsyncpa [#allocation10 + $0x1], 1 }

</bundles_post_ra>
